<compile_context>
chip_gen: v7x
topology: tpu7x:2x2x1
jax: 0.10.0
libtpu: 0.0.40
codegen_flags: <defaults>
</compile_context>

<pallas_src>
import math

import jax
import jax.numpy as jnp
from jax.experimental import pallas as pl
from jax.experimental.pallas import tpu as pltpu


def _round_up(a, b):
    return (a + b - 1) // b * b


def _tanh_gelu(x):
    # 0.5 * x * (1 + tanh(sqrt(2/pi) * (x + 0.044715 * x^3)))
    c = math.sqrt(2.0 / math.pi)
    return 0.5 * x * (1.0 + jnp.tanh(c * (x + 0.044715 * x * x * x)))


def _ffn_kernel(x_ref, w1_ref, b1_ref, w2_ref, b2_ref, o_ref, acc_ref):
    # Grid: (M/tm token tiles [parallel], hidden/th chunks [arbitrary]).
    # x:  [tm, dim_p]    w1: [dim_p, th]   b1: [1, th]
    # w2: [th, dim_p]    b2: [1, dim_p]    o:  [tm, dim_p]
    # acc (VMEM scratch): [tm, dim_p] f32, resident across the hidden axis.
    k = pl.program_id(1)

    @pl.when(k == 0)
    def _():
        acc_ref[...] = jnp.zeros_like(acc_ref)

    # Native-dtype operands on the MXU; f32 accumulation.
    h = jnp.dot(x_ref[...], w1_ref[...], preferred_element_type=jnp.float32)
    h = _tanh_gelu(h + b1_ref[...].astype(jnp.float32))
    # Dropout(p=0.0) is the identity in both train and eval -> no-op.

    acc_ref[...] += jnp.dot(h.astype(x_ref.dtype), w2_ref[...],
                            preferred_element_type=jnp.float32)

    @pl.when(k == pl.num_programs(1) - 1)
    def _():
        y = acc_ref[...] + b2_ref[...].astype(jnp.float32)
        o_ref[...] = y.astype(o_ref.dtype)


def feedforward(x, w1, b1, w2, b2, *, tm=None, th=None):
    """x: [..., dim]; w1: [dim, hidden]; w2: [hidden, dim]. Same shape/dtype out."""
    orig_shape = x.shape
    dim = orig_shape[-1]
    hidden = w1.shape[1]
    x2d = x.reshape(-1, dim)
    M = x2d.shape[0]

    # Lane-dense padding: all last dims presented to the MXU are 128-multiples.
    dim_p = _round_up(dim, 128)
    hid_p = _round_up(hidden, 128)

    # Token tile: a fixed tile (not tm=M), rounded to the sublane multiple, but
    # never larger than the (rounded) problem.
    if x.dtype == jnp.bfloat16:
        sub, tm_default = 16, 512
    else:
        sub, tm_default = 8, 256
    if tm is None:
        tm = tm_default
    tm = _round_up(min(tm, _round_up(M, sub)), sub)
    M_p = _round_up(M, tm)

    # Hidden chunk: bounds the live [tm, th] intermediate; multiple of 128.
    if th is None:
        if hid_p <= 512:
            th = hid_p
        else:
            th = next(c for c in (512, 384, 256, 128) if hid_p % c == 0)
    assert th % 128 == 0 and hid_p % th == 0

    # Zero padding is exact: gelu(0) = 0 and zero rows/cols contribute nothing.
    xp = jnp.pad(x2d, ((0, M_p - M), (0, dim_p - dim)))
    w1p = jnp.pad(w1, ((0, dim_p - dim), (0, hid_p - hidden)))
    b1p = jnp.pad(b1, (0, hid_p - hidden)).reshape(1, hid_p)
    w2p = jnp.pad(w2, ((0, hid_p - hidden), (0, dim_p - dim)))
    b2p = jnp.pad(b2, (0, dim_p - dim)).reshape(1, dim_p)

    grid = (M_p // tm, hid_p // th)

    # VMEM budget: double-buffered x/out tiles, weight-chunk buffers, biases,
    # the f32 accumulator and the live [tm, th] intermediate (+25% headroom).
    isz = jnp.dtype(x.dtype).itemsize
    wsz = jnp.dtype(w1.dtype).itemsize
    need = (2 * tm * dim_p * isz                      # x tiles (dbl-buffered)
            + 2 * tm * dim_p * isz                    # out tiles
            + 2 * (dim_p * th + th * dim_p) * wsz     # w1/w2 chunk buffers
            + 2 * 2 * (th + dim_p) * wsz              # biases
            + tm * dim_p * 4                          # acc scratch
            + 2 * tm * th * 4)                        # live h + slack
    vmem_limit = int(min(max(need * 5 // 4, 32 * 1024 * 1024),
                         64 * 1024 * 1024))

    cost = pl.CostEstimate(
        flops=4 * M_p * dim_p * hid_p,                # two matmuls
        transcendentals=M_p * hid_p,                  # tanh in GELU
        bytes_accessed=(2 * M_p * dim_p * isz
                        + (w1p.size + w2p.size) * wsz * (M_p // tm)
                        + (b1p.size + b2p.size) * wsz),
    )

    out = pl.pallas_call(
        _ffn_kernel,
        out_shape=jax.ShapeDtypeStruct((M_p, dim_p), x.dtype),
        grid_spec=pltpu.PrefetchScalarGridSpec(
            num_scalar_prefetch=0,
            grid=grid,
            in_specs=[
                pl.BlockSpec((tm, dim_p), lambda i, k: (i, 0)),
                pl.BlockSpec((dim_p, th), lambda i, k: (0, k)),
                pl.BlockSpec((1, th), lambda i, k: (0, k)),
                pl.BlockSpec((th, dim_p), lambda i, k: (k, 0)),
                pl.BlockSpec((1, dim_p), lambda i, k: (0, 0)),
            ],
            out_specs=pl.BlockSpec((tm, dim_p), lambda i, k: (i, 0)),
            scratch_shapes=[pltpu.VMEM((tm, dim_p), jnp.float32)],
        ),
        compiler_params=pltpu.CompilerParams(
            dimension_semantics=("parallel", "arbitrary"),
            vmem_limit_bytes=vmem_limit,
        ),
        cost_estimate=cost,
    )(xp, w1p, b1p, w2p, b2p)

    return out[:M, :dim].reshape(orig_shape)


def _init_params(key, dim, hidden_dim, dtype=jnp.float32):
    # Deterministic init mirroring nn.Linear's uniform(-1/sqrt(fan_in), ...);
    # weights stored as [in, out] (transpose of PyTorch's [out, in]).
    k1, k2, k3, k4 = jax.random.split(key, 4)
    lim1 = 1.0 / math.sqrt(dim)
    lim2 = 1.0 / math.sqrt(hidden_dim)
    w1 = jax.random.uniform(k1, (dim, hidden_dim), dtype, -lim1, lim1)
    b1 = jax.random.uniform(k2, (hidden_dim,), dtype, -lim1, lim1)
    w2 = jax.random.uniform(k3, (hidden_dim, dim), dtype, -lim2, lim2)
    b2 = jax.random.uniform(k4, (dim,), dtype, -lim2, lim2)
    return w1, b1, w2, b2


if __name__ == "__main__":
    batch, seq, dim, hidden_dim = 2, 8, 32, 64

    key = jax.random.PRNGKey(0)
    kx, kp = jax.random.split(key)
    x = jax.random.normal(kx, (batch, seq, dim), jnp.float32)
    w1, b1, w2, b2 = _init_params(kp, dim, hidden_dim)

    y = feedforward(x, w1, b1, w2, b2)
    jax.block_until_ready(y)

    # Pure-JAX reference check of the fused kernel.
    ref = _tanh_gelu(x @ w1 + b1) @ w2 + b2
    assert y.shape == x.shape and y.dtype == x.dtype
    assert jnp.allclose(y, ref, atol=1e-4, rtol=1e-4), float(
        jnp.max(jnp.abs(y - ref)))

    print("KERNEL_OK")
</pallas_src>

<mosaic_0001>
module attributes {stable_mosaic.version = 11 : i64} {
  func.func @_ffn_kernel(%arg0: i32, %arg1: i32, %arg2: memref<16x128xf32, #tpu.memory_space<vmem>>, %arg3: memref<128x128xf32, #tpu.memory_space<vmem>>, %arg4: memref<1x128xf32, #tpu.memory_space<vmem>>, %arg5: memref<128x128xf32, #tpu.memory_space<vmem>>, %arg6: memref<1x128xf32, #tpu.memory_space<vmem>>, %arg7: memref<16x128xf32, #tpu.memory_space<vmem>>, %arg8: memref<16x128xf32, #tpu.memory_space<vmem>>) attributes {dimension_semantics = [#tpu.dimension_semantics<parallel>, #tpu.dimension_semantics<arbitrary>], iteration_bounds = array<i64: 1, 1>, scalar_prefetch = 0 : i64, scratch_operands = 1 : i64, tpu.core_type = #tpu.core_type<tc>, window_params = [{transform_indices = @transform_0, window_bounds = array<i64: 16, 128>}, {transform_indices = @transform_1, window_bounds = array<i64: 128, 128>}, {transform_indices = @transform_2, window_bounds = array<i64: 1, 128>}, {transform_indices = @transform_3, window_bounds = array<i64: 128, 128>}, {pipeline_mode = #tpu.pipeline_mode<synchronous>, transform_indices = @transform_4, window_bounds = array<i64: 1, 128>}, {transform_indices = @transform_5, window_bounds = array<i64: 16, 128>}]} {
    %c0_i32 = arith.constant 0 : i32
    %0 = arith.cmpi eq, %arg1, %c0_i32 : i32
    %1 = arith.extui %0 : i1 to i32
    %c0_i32_0 = arith.constant 0 : i32
    %2 = arith.cmpi ne, %1, %c0_i32_0 : i32
    scf.if %2 {
      %cst_19 = arith.constant 0.000000e+00 : f32
      %30 = vector.broadcast %cst_19 : f32 to vector<16x128xf32>
      %c0_20 = arith.constant 0 : index
      %c0_21 = arith.constant 0 : index
      %31 = vector.load %arg8[%c0_20, %c0_21] : memref<16x128xf32, #tpu.memory_space<vmem>>, vector<16x128xf32>
      tpu.vector_store %arg8[%c0_20, %c0_21], %30 {strides = array<i32>} : memref<16x128xf32, #tpu.memory_space<vmem>>, vector<16x128xf32>,
    } else {
    }
    %c0 = arith.constant 0 : index
    %c0_1 = arith.constant 0 : index
    %3 = vector.load %arg2[%c0, %c0_1] : memref<16x128xf32, #tpu.memory_space<vmem>>, vector<16x128xf32>
    %c0_2 = arith.constant 0 : index
    %c0_3 = arith.constant 0 : index
    %4 = vector.load %arg3[%c0_2, %c0_3] : memref<128x128xf32, #tpu.memory_space<vmem>>, vector<128x128xf32>
    %cst = arith.constant dense<0.000000e+00> : vector<16x128xf32>
    %5 = tpu.matmul %3, %4, %cst {dimension_numbers = #tpu.dot_dimension_numbers<[1], [0], [0], [1], [0, 0, 1, 1], [], []>} : vector<16x128xf32>, vector<128x128xf32>, vector<16x128xf32> -> vector<16x128xf32>
    %c0_4 = arith.constant 0 : index
    %c0_5 = arith.constant 0 : index
    %6 = vector.load %arg4[%c0_4, %c0_5] : memref<1x128xf32, #tpu.memory_space<vmem>>, vector<1x128xf32>
    %7 = vector.broadcast %6 : vector<1x128xf32> to vector<16x128xf32>
    %8 = arith.addf %5, %7 : vector<16x128xf32>
    %cst_6 = arith.constant 5.000000e-01 : f32
    %9 = vector.broadcast %cst_6 : f32 to vector<16x128xf32>
    %10 = arith.mulf %9, %8 : vector<16x128xf32>
    %cst_7 = arith.constant 4.471500e-02 : f32
    %11 = vector.broadcast %cst_7 : f32 to vector<16x128xf32>
    %12 = arith.mulf %11, %8 : vector<16x128xf32>
    %13 = arith.mulf %12, %8 : vector<16x128xf32>
    %14 = arith.mulf %13, %8 : vector<16x128xf32>
    %15 = arith.addf %8, %14 : vector<16x128xf32>
    %cst_8 = arith.constant 0.797884583 : f32
    %16 = vector.broadcast %cst_8 : f32 to vector<16x128xf32>
    %17 = arith.mulf %16, %15 : vector<16x128xf32>
    %18 = math.tanh %17 : vector<16x128xf32>
    %cst_9 = arith.constant 1.000000e+00 : f32
    %19 = vector.broadcast %cst_9 : f32 to vector<16x128xf32>
    %20 = arith.addf %19, %18 : vector<16x128xf32>
    %21 = arith.mulf %10, %20 : vector<16x128xf32>
    %c0_10 = arith.constant 0 : index
    %c0_11 = arith.constant 0 : index
    %22 = vector.load %arg8[%c0_10, %c0_11] : memref<16x128xf32, #tpu.memory_space<vmem>>, vector<16x128xf32>
    %c0_12 = arith.constant 0 : index
    %c0_13 = arith.constant 0 : index
    %23 = vector.load %arg5[%c0_12, %c0_13] : memref<128x128xf32, #tpu.memory_space<vmem>>, vector<128x128xf32>
    %cst_14 = arith.constant dense<0.000000e+00> : vector<16x128xf32>
    %24 = tpu.matmul %21, %23, %cst_14 {dimension_numbers = #tpu.dot_dimension_numbers<[1], [0], [0], [1], [0, 0, 1, 1], [], []>} : vector<16x128xf32>, vector<128x128xf32>, vector<16x128xf32> -> vector<16x128xf32>
    %25 = arith.addf %22, %24 : vector<16x128xf32>
    %c0_15 = arith.constant 0 : index
    %c0_16 = arith.constant 0 : index
    %26 = vector.load %arg8[%c0_15, %c0_16] : memref<16x128xf32, #tpu.memory_space<vmem>>, vector<16x128xf32>
    tpu.vector_store %arg8[%c0_15, %c0_16], %25 {strides = array<i32>} : memref<16x128xf32, #tpu.memory_space<vmem>>, vector<16x128xf32>,
    %c0_i32_17 = arith.constant 0 : i32
    %27 = arith.cmpi eq, %arg1, %c0_i32_17 : i32
    %28 = arith.extui %27 : i1 to i32
    %c0_i32_18 = arith.constant 0 : i32
    %29 = arith.cmpi ne, %28, %c0_i32_18 : i32
    scf.if %29 {
      %c0_19 = arith.constant 0 : index
      %c0_20 = arith.constant 0 : index
      %30 = vector.load %arg8[%c0_19, %c0_20] : memref<16x128xf32, #tpu.memory_space<vmem>>, vector<16x128xf32>
      %c0_21 = arith.constant 0 : index
      %c0_22 = arith.constant 0 : index
      %31 = vector.load %arg6[%c0_21, %c0_22] : memref<1x128xf32, #tpu.memory_space<vmem>>, vector<1x128xf32>
      %32 = vector.broadcast %31 : vector<1x128xf32> to vector<16x128xf32>
      %33 = arith.addf %30, %32 : vector<16x128xf32>
      %c0_23 = arith.constant 0 : index
      %c0_24 = arith.constant 0 : index
      %34 = vector.load %arg7[%c0_23, %c0_24] : memref<16x128xf32, #tpu.memory_space<vmem>>, vector<16x128xf32>
      tpu.vector_store %arg7[%c0_23, %c0_24], %33 {strides = array<i32>} : memref<16x128xf32, #tpu.memory_space<vmem>>, vector<16x128xf32>,
    } else {
    }
    return
  }
  func.func @transform_0(%arg0: i32, %arg1: i32) -> (i32, i32) {
    %c0_i32 = arith.constant 0 : i32
    %c0_i32_0 = arith.constant 0 : i32
    return %arg0, %c0_i32 : i32, i32
  }
  func.func @transform_1(%arg0: i32, %arg1: i32) -> (i32, i32) {
    %c0_i32 = arith.constant 0 : i32
    %c0_i32_0 = arith.constant 0 : i32
    return %c0_i32, %arg1 : i32, i32
  }
  func.func @transform_2(%arg0: i32, %arg1: i32) -> (i32, i32) {
    %c0_i32 = arith.constant 0 : i32
    %c0_i32_0 = arith.constant 0 : i32
    return %c0_i32, %arg1 : i32, i32
  }
  func.func @transform_3(%arg0: i32, %arg1: i32) -> (i32, i32) {
    %c0_i32 = arith.constant 0 : i32
    %c0_i32_0 = arith.constant 0 : i32
    return %arg1, %c0_i32 : i32, i32
  }
  func.func @transform_4(%arg0: i32, %arg1: i32) -> (i32, i32) {
    %c0_i32 = arith.constant 0 : i32
    %c0_i32_0 = arith.constant 0 : i32
    %c0_i32_1 = arith.constant 0 : i32
    return %c0_i32, %c0_i32_0 : i32, i32
  }
  func.func @transform_5(%arg0: i32, %arg1: i32) -> (i32, i32) {
    %c0_i32 = arith.constant 0 : i32
    %c0_i32_0 = arith.constant 0 : i32
    return %arg0, %c0_i32 : i32, i32
  }
}

</mosaic_0001>

<bundles_post_ra>
// kernel: tpu_custom_call.1
= control target key start
LH: loop header
LB: loop body
LE: loop exit
PB: predicated region body
PF: predicated region fallthrough
CT: control target
= control target key end

     0   :  { %10 = vsyncpa [#allocation4], 0  ;;  %s702_s0 = inlined_call_operand.hbm [shape: f32[16,128], index: 0, kind: input, shape index: {}]   ;;  %s703_s1 = inlined_call_operand.hbm [shape: f32[128,128], index: 1, kind: input, shape index: {}]   ;;  %s704_s2 = inlined_call_operand.vmem [shape: f32[1,128], index: 2, kind: input, shape index: {}]   ;;  %s705_s3 = inlined_call_operand.hbm [shape: f32[128,128], index: 3, kind: input, shape index: {}]   ;;  %s706_s4 = inlined_call_operand.vmem [shape: f32[1,128], index: 4, kind: input, shape index: {}]   ;;  %s707_s5 = inlined_call_operand.hbm [shape: f32[16,128], index: 5, kind: output, shape index: {}]  }
   0x1   :  { %11 = vsyncpa [#allocation7], 0 }
   0x2   :  { %12 = vsyncpa [#allocation5], 0  ;;  %s593_s18 = smov [#allocation6]   ;;  %s594_s20 = smov [#allocation3]  }
   0x3   :  { %s30_s19 = sshll.u32 %s593_s18, 4  ;;  %s18_s21 = sshll.u32 %s594_s20, 4  ;;  %s31_s19 = int_to_ptr.vmem [resolvable:$true] %s30_s19  ;;  %s629_s21 = int_to_ptr.vmem [resolvable:$true] %s18_s21 }
   0x4   :  { %s499_s24 = scalar_lea.hbm %s703_s1, 2048 }
   0x5   :  { %p500_p0 = scmp.ne.s32.totalorder %s703_s1, %s499_s24  ;;  %p503_p1 = scmp.lt.u32.totalorder %s499_s24, %s703_s1 }
   0x7   :  { %p505_p2 = pnand %p503_p1, %p500_p0 }
   0x9   :  { %508 = shalt.err (!%p505_p2)
}
   0xa   :  { %s509_s29 = scalar_lea.vmem %s31_s19, 2048  ;;  %p514_p4 = scmp.lt.s32.totalorder %s31_s19, %s31_s19 }
   0xb   :  { %p510_p3 = scmp.ne.s32.totalorder %s31_s19, %s509_s29  ;;  %p515_p5 = scmp.lt.s32.totalorder %s509_s29, %s509_s29 }
   0xd   :  { %p516_p6 = por %p515_p5, %p514_p4 }
   0xf   :  { %p517_p7 = pnand %p516_p6, %p510_p3 }
  0x11   :  { %520 = shalt.err (!%p517_p7)
}
  0x12   :  { %s595_s30 = smov 128   ;;  %s596_s6 = smov 8  }
  0x13   :  { %36 = dma.hbm_to_vmem [thread:$0]  %s703_s1, 2048, %s31_s19, [#allocation7], %s595_s30, %s595_s30, %s596_s6  }
  0x14   :  { %s521_s11 = scalar_lea.hbm %s702_s0, 256 }
  0x15   :  { %p522_p8 = scmp.ne.s32.totalorder %s702_s0, %s521_s11  ;;  %p525_p9 = scmp.lt.u32.totalorder %s521_s11, %s702_s0 }
  0x17   :  { %p527_p10 = pnand %p525_p9, %p522_p8 }
  0x19   :  { %530 = shalt.err (!%p527_p10)
}
  0x1a   :  { %s531_s16 = scalar_lea.vmem %s629_s21, 256  ;;  %p536_p12 = scmp.lt.s32.totalorder %s629_s21, %s629_s21 }
  0x1b   :  { %p532_p11 = scmp.ne.s32.totalorder %s629_s21, %s531_s16  ;;  %p537_p13 = scmp.lt.s32.totalorder %s531_s16, %s531_s16 }
  0x1d   :  { %p538_p0 = por %p537_p13, %p536_p12 }
  0x1f   :  { %p539_p1 = pnand %p538_p0, %p532_p11 }
  0x21   :  { %542 = shalt.err (!%p539_p1)
}
  0x22   :  { %24 = dma.hbm_to_vmem [thread:$0]  %s702_s0, 256, %s629_s21, [#allocation4], %s595_s30, %s595_s30, %s596_s6  }
  0x23   :  { %s597_s18 = smov [#allocation8]   ;;  %s543_s23 = scalar_lea.hbm %s705_s3, 2048 }
  0x24   :  { %s44_s19 = sshll.u32 %s597_s18, 4  ;;  %p544_p2 = scmp.ne.s32.totalorder %s705_s3, %s543_s23  ;;  %s45_s19 = int_to_ptr.vmem [resolvable:$true] %s44_s19 }
  0x25   :  { %p547_p3 = scmp.lt.u32.totalorder %s543_s23, %s705_s3 }
  0x27   :  { %p549_p4 = pnand %p547_p3, %p544_p2 }
  0x29   :  { %552 = shalt.err (!%p549_p4)
}
  0x2a   :  { %s553_s28 = scalar_lea.vmem %s45_s19, 2048  ;;  %p558_p6 = scmp.lt.s32.totalorder %s45_s19, %s45_s19 }
  0x2b   :  { %p554_p5 = scmp.ne.s32.totalorder %s45_s19, %s553_s28  ;;  %p559_p7 = scmp.lt.s32.totalorder %s553_s28, %s553_s28 }
  0x2d   :  { %p560_p8 = por %p559_p7, %p558_p6 }
  0x2f   :  { %p561_p9 = pnand %p560_p8, %p554_p5 }
  0x31   :  { %564 = shalt.err (!%p561_p9)
}
  0x32   :  { %50 = dma.hbm_to_vmem [thread:$0]  %s705_s3, 2048, %s45_s19, [#allocation7], %s595_s30, %s595_s30, %s596_s6  }
  0x33   :  { %587 = dma.done.wait [#allocation4], 256  }
  0x34   :  { %588 = vsyncadd [#allocation4], 4294967040 }
  0x35   :  { %589 = dma.done.wait [#allocation7], 4096  }
  0x36   :  { %590 = vsyncadd [#allocation7], 4294963200  ;;  %v70_v0 = vld [vmem:[#allocation6] sm:$0xff]  ;;  %v71_v1 = vld [vmem:[#allocation6 + $0x8] sm:$0xff]  ;;  %s598_s8 = smov [#allocation9]  }
  0x37   :  { %v72_v2 = vld [vmem:[#allocation6 + $0x10] sm:$0xff]  ;;  %v425_v3 = vpack.c.bf16 %v71_v1, %v70_v0  ;;  %v73_v4 = vld [vmem:[#allocation6 + $0x18] sm:$0xff]  ;;  %v74_v6 = vld [vmem:[#allocation6 + $0x20] sm:$0xff]  ;;  %s304_s9 = sshll.u32 %s598_s8, 4  ;;  %s305_s9 = int_to_ptr.vmem [resolvable:$true] %s304_s9 }
  0x38   :  { %v429_v5 = vpack.c.bf16 %v73_v4, %v72_v2  ;;  %v75_v7 = vld [vmem:[#allocation6 + $0x28] sm:$0xff]  ;;  %v76_v9 = vld [vmem:[#allocation6 + $0x30] sm:$0xff]  ;;  %v77_v11 = vld [vmem:[#allocation6 + $0x38] sm:$0xff]  ;;  %s565_s10 = scalar_lea.vmem %s305_s9, 256  ;;  %p570_p11 = scmp.lt.s32.totalorder %s305_s9, %s305_s9 }
  0x39   :  { %426 = vmatprep.subr.bf16.mxu0 %v425_v3  ;;  %v433_v8 = vpack.c.bf16 %v75_v7, %v74_v6  ;;  %v68_v10 = vld [vmem:[#allocation3] sm:$0xff]  ;;  %v188_v12 = vld [vmem:[#allocation8] sm:$0xff]  ;;  %v189_v13 = vld [vmem:[#allocation8 + $0x8] sm:$0xff]  ;;  %v437_v15 = vpack.c.bf16 %v77_v11, %v76_v9  ;;  %p566_p10 = scmp.ne.s32.totalorder %s305_s9, %s565_s10  ;;  %p571_p12 = scmp.lt.s32.totalorder %s565_s10, %s565_s10 }
  0x3a   :  { %428 = vmatpush3.bf16.msra.mxu0 %v425_v3  ;;  %387 = vmatprep.mubr.f32.mxu0 %v68_v10  ;;  %v457_v14 = vpack.c.bf16 %v189_v13, %v188_v12  ;;  %v78_v16 = vld [vmem:[#allocation6 + $0x40] sm:$0xff]  ;;  %v79_v17 = vld [vmem:[#allocation6 + $0x48] sm:$0xff]  ;;  %v80_v19 = vld [vmem:[#allocation6 + $0x50] sm:$0xff] }
  0x3b   :  { %430 = vmatprep.subr.bf16.mxu0 %v429_v5  ;;  %v441_v18 = vpack.c.bf16 %v79_v17, %v78_v16  ;;  %v81_v20 = vld [vmem:[#allocation6 + $0x58] sm:$0xff]  ;;  %v82_v22 = vld [vmem:[#allocation6 + $0x60] sm:$0xff]  ;;  %v83_v23 = vld [vmem:[#allocation6 + $0x68] sm:$0xff]  ;;  %p572_p13 = por %p571_p12, %p570_p11 }
  0x3c   :  { %458 = vmatprep.subr.bf16.mxu1 %v457_v14  ;;  %v445_v21 = vpack.c.bf16 %v81_v20, %v80_v19  ;;  %v449_v24 = vpack.c.bf16 %v83_v23, %v82_v22  ;;  %v84_v25 = vld [vmem:[#allocation6 + $0x70] sm:$0xff]  ;;  %v85_v26 = vld [vmem:[#allocation6 + $0x78] sm:$0xff]  ;;  %v192_v32 = vld [vmem:[#allocation8 + $0x20] sm:$0xff] }
  0x3d   :  { %460 = vmatpush3.bf16.msra.mxu1 %v457_v14  ;;  %v453_v27 = vpack.c.bf16 %v85_v26, %v84_v25  ;;  %v69_v28 = vld [vmem:[#allocation3 + $0x8] sm:$0xff]  ;;  %v190_v29 = vld [vmem:[#allocation8 + $0x10] sm:$0xff]  ;;  %v193_v33 = vld [vmem:[#allocation8 + $0x28] sm:$0xff]  ;;  %p573_p0 = pnand %p572_p13, %p566_p10 }
  0x3e   :  { %432 = vmatpush3.bf16.msra.mxu0 %v429_v5  ;;  %v191_v30 = vld [vmem:[#allocation8 + $0x18] sm:$0xff]  ;;  %v465_v34 = vpack.c.bf16 %v193_v33, %v192_v32  ;;  %v194_v35 = vld [vmem:[#allocation8 + $0x30] sm:$0xff]  ;;  %v196_v37 = vld [vmem:[#allocation8 + $0x40] sm:$0xff] }
  0x3f   :  { %434 = vmatprep.subr.bf16.mxu0 %v433_v8  ;;  %v461_v31 = vpack.c.bf16 %v191_v30, %v190_v29  ;;  %v195_v36 = vld [vmem:[#allocation8 + $0x38] sm:$0xff]  ;;  %v197_v39 = vld [vmem:[#allocation8 + $0x48] sm:$0xff]  ;;  %v198_v41 = vld [vmem:[#allocation8 + $0x50] sm:$0xff] }
  0x40   :  { %v469_v38 = vpack.c.bf16 %v195_v36, %v194_v35  ;;  %v473_v40 = vpack.c.bf16 %v197_v39, %v196_v37  ;;  %v199_v42 = vld [vmem:[#allocation8 + $0x58] sm:$0xff]  ;;  %v200_v44 = vld [vmem:[#allocation8 + $0x60] sm:$0xff]  ;;  %v201_v45 = vld [vmem:[#allocation8 + $0x68] sm:$0xff] }
  0x41   :  { %462 = vmatprep.subr.bf16.mxu1 %v461_v31  ;;  %v477_v43 = vpack.c.bf16 %v199_v42, %v198_v41  ;;  %v481_v46 = vpack.c.bf16 %v201_v45, %v200_v44  ;;  %v202_v47 = vld [vmem:[#allocation8 + $0x70] sm:$0xff]  ;;  %v203_v48 = vld [vmem:[#allocation8 + $0x78] sm:$0xff] }
  0x42   :  { %436 = vmatpush3.bf16.msra.mxu0 %v433_v8  ;;  %464 = vmatpush3.bf16.msra.mxu1 %v461_v31  ;;  %v485_v49 = vpack.c.bf16 %v203_v48, %v202_v47  ;;  %v317_v50 = vld [vmem:[%s704_s2] ss:$0 sm:$0xff] }
  0x43   :  { %438 = vmatprep.subr.bf16.mxu0 %v437_v15  ;;  %466 = vmatprep.subr.bf16.mxu1 %v465_v34  ;;  %v318_v9 = vld [vmem:[%s706_s4] ss:$0 sm:$0xff] }
  0x46   :  { %440 = vmatpush3.bf16.msra.mxu0 %v437_v15  ;;  %468 = vmatpush3.bf16.msra.mxu1 %v465_v34 }
  0x47   :  { %442 = vmatprep.subr.bf16.mxu0 %v441_v18  ;;  %470 = vmatprep.subr.bf16.mxu1 %v469_v38 }
  0x4a   :  { %444 = vmatpush3.bf16.msra.mxu0 %v441_v18  ;;  %472 = vmatpush3.bf16.msra.mxu1 %v469_v38 }
  0x4b   :  { %446 = vmatprep.subr.bf16.mxu0 %v445_v21  ;;  %474 = vmatprep.subr.bf16.mxu1 %v473_v40 }
  0x4e   :  { %448 = vmatpush3.bf16.msra.mxu0 %v445_v21  ;;  %476 = vmatpush3.bf16.msra.mxu1 %v473_v40 }
  0x4f   :  { %450 = vmatprep.subr.bf16.mxu0 %v449_v24  ;;  %478 = vmatprep.subr.bf16.mxu1 %v477_v43 }
  0x52   :  { %452 = vmatpush3.bf16.msra.mxu0 %v449_v24  ;;  %480 = vmatpush3.bf16.msra.mxu1 %v477_v43 }
  0x53   :  { %454 = vmatprep.subr.bf16.mxu0 %v453_v27  ;;  %482 = vmatprep.subr.bf16.mxu1 %v481_v46 }
  0x56   :  { %456 = vmatpush3.bf16.msra.mxu0 %v453_v27  ;;  %484 = vmatpush3.bf16.msra.mxu1 %v481_v46 }
  0x57   :  { %486 = vmatprep.subr.bf16.mxu1 %v485_v49 }
  0x59   :  { %388 = vmatmul.mubr.f32.vlgmr.msra.gmra.mrb[0].mxu0 %v69_v28 }
  0x5a   :  { %488 = vmatpush3.bf16.msra.mxu1 %v485_v49 }
 0x12c   :  { %v389_v51 = vpop.f32.mrb[0].mxu0 }
 0x12d   :  { %v165_v52 = vadd.f32 %v389_v51, %v317_v50  ;;  %v159_v53 = vpop.f32.mrb[1].mxu0 }
 0x12e   :  { %v160_v54 = vadd.f32 %v317_v50, %v159_v53 }
 0x12f   :  { %v171_v55 = vmul.f32 0.044715, %v165_v52  ;;  %v169_v6 = vmul.f32 0.5, %v165_v52 }
 0x130   :  { %v170_v56 = vmul.f32 0.044715, %v160_v54  ;;  %v168_v4 = vmul.f32 0.5, %v160_v54 }
 0x131   :  { %v173_v57 = vmul.f32 %v171_v55, %v165_v52 }
 0x132   :  { %v172_v58 = vmul.f32 %v170_v56, %v160_v54 }
 0x133   :  { %v175_v59 = vmul.f32 %v173_v57, %v165_v52 }
 0x134   :  { %v174_v60 = vmul.f32 %v172_v58, %v160_v54 }
 0x135   :  { %v177_v61 = vadd.f32 %v175_v59, %v165_v52 }
 0x136   :  { %v176_v62 = vadd.f32 %v174_v60, %v160_v54 }
 0x137   :  { %v179_v63 = vmul.f32 0.7978846, %v177_v61 }
 0x138   :  { %v178_v0 = vmul.f32 0.7978846, %v176_v62 }
 0x139   :  { %495 = vtanh.f32 %v179_v63 }
 0x13a   :  { %497 = vtanh.f32 %v178_v0 }
 0x143   :  { %v496_v1 = vpop.eup %495 }
 0x144   :  { %v498_v2 = vpop.eup %497  ;;  %v183_v3 = vadd.f32 1.0, %v496_v1 }
 0x145   :  { %v182_v5 = vadd.f32 1.0, %v498_v2 }
 0x146   :  { %v185_v8 = vmul.f32 %v183_v3, %v169_v6 }
 0x147   :  { %v184_v7 = vmul.f32 %v182_v5, %v168_v4 }
 0x149   :  { %422 = vmatprep.mubr.f32.mxu1 %v184_v7 }
 0x14a   :  { %423 = vmatmul.mubr.f32.vlgmr.msra.gmra.mrb[0].mxu1 %v185_v8 }
 0x21d   :  { %v424_v10 = vpop.f32.mrb[0].mxu1 }
 0x21e   :  { %v296_v11 = vadd.f32 %v424_v10, %v318_v9  ;;  %v270_v12 = vpop.f32.mrb[1].mxu1 }
 0x21f   :  { %v295_v13 = vadd.f32 %v318_v9, %v270_v12 }
 0x220   :  { %298 = vst [vmem:[#allocation9 + $0x8] sm:$0xff] %v296_v11 }
 0x221   :  { %297 = vst [vmem:[#allocation9] sm:$0xff] %v295_v13 }
 0x222   :  { %576 = shalt.err (!%p573_p0)
}
 0x223   :  { %s577_s4 = scalar_lea.hbm %s707_s5, 256 }
 0x224   :  { %p578_p1 = scmp.ne.s32.totalorder %s707_s5, %s577_s4  ;;  %p581_p2 = scmp.lt.u32.totalorder %s577_s4, %s707_s5 }
 0x226   :  { %p583_p3 = pnand %p581_p2, %p578_p1 }
 0x228   :  { %586 = shalt.err (!%p583_p3)
}
 0x229   :  { %310 = dma.vmem_to_hbm [thread:$0]  %s305_s9, 256, %s707_s5, [#allocation5], %s595_s30, %s595_s30, %s596_s6  }
 0x22a   :  { %591 = dma.done.wait [#allocation5], 256  }
 0x22b   :  { %592 = vsyncadd [#allocation5], 4294967040 }
 0x22c   :  { %314 = vsyncpa [#allocation4], 1 }
 0x22d   :  { %315 = vsyncpa [#allocation7], 1 }
 0x22e   :  { %316 = vsyncpa [#allocation5], 1 }

</bundles_post_ra>
